<compile_context>
chip_gen: v6e
topology: v6e:2x2x1
jax: 0.10.0
libtpu: 0.0.40
codegen_flags: <defaults>
</compile_context>

<pallas_src>
import functools

import jax
import jax.numpy as jnp
from jax.experimental import pallas as pl
from jax.experimental.pallas import tpu as pltpu

_MIB = 1024 * 1024


def _vmem_capacity_bytes():
    """Best-effort per-core VMEM capacity query; conservative (v7x) fallback."""
    try:
        cap = int(pltpu.get_tpu_info().vmem_capacity_bytes)
        if cap > 0:
            return cap
    except Exception:
        pass
    return 64 * _MIB


def _sublane_multiple(itemsize):
    # Minimum second-to-last tile dim for packed dtypes: f32->8, bf16->16, i8/fp8->32.
    return max(8, 32 // max(int(itemsize), 1))


def _pick_tile_rows(n_rows, n_cols, itemsize_a, itemsize_b, vmem_cap):
    """Largest row tile such that pipeline buffers + f32 temporaries fit VMEM."""
    sub = max(_sublane_multiple(itemsize_a), _sublane_multiple(itemsize_b))
    c_phys = -(-n_cols // 128) * 128                 # physical lane-padded width
    # Working budget for (2 inputs x 2 pipeline buffers) + full-tile f32 temps;
    # leaves headroom for output buffers, regalloc and Mosaic internal scratch.
    big_vmem = vmem_cap >= 100 * _MIB                # v5e/v6e: 128 MiB; v7x: 64 MiB
    work_budget = (48 if big_vmem else 26) * _MIB
    n_f32_temps = 4                                  # shifted / exp / product / casts
    bytes_per_row = (2 * c_phys * (itemsize_a + itemsize_b)   # 2 bufs per input
                     + n_f32_temps * c_phys * 4)
    tile = work_budget // max(bytes_per_row, 1)
    # ~2-4 MiB per input block already sits at >85% of the HBM roofline; bigger
    # blocks just burn VMEM.
    per_input_cap = (4 * _MIB) // max(c_phys * max(itemsize_a, itemsize_b), 1)
    tile = min(tile, per_input_cap)
    # No need to exceed the (sublane-rounded) batch.
    b_rounded = -(-n_rows // sub) * sub
    tile = min(tile, b_rounded)
    return int(max(sub, (tile // sub) * sub))


def _softlabel_ce_kernel(logits_ref, labels_ref, out_ref, *, tile_rows, n_rows,
                         mask_rows, labels_normalized):
    x = logits_ref[...]       # (tile_rows, C), native dtype
    sl = labels_ref[...]      # (tile_rows, C), native dtype

    bf16_native = (x.dtype == jnp.bfloat16 and sl.dtype == jnp.bfloat16)

    if bf16_native:
        # v6e/v7x have native bf16 VPU: keep the cheap elementwise ops (max,
        # subtract, label product) at bf16 width; exp/log and all reduction
        # accumulation stay in f32.
        # TODO(synk): if xprof shows EUP saturation on v7x, feed bf16 directly
        # into jnp.exp and accumulate the sum in f32.
        m = jnp.max(x, axis=-1, keepdims=True)                       # exact in bf16
        shifted = x - m                                              # bf16 VALU
        e = jnp.exp(shifted.astype(jnp.float32))                     # EUP, f32
        lse = jnp.log(jnp.sum(e, axis=-1, keepdims=True))            # (tm, 1) f32
        dot = jnp.sum((sl * shifted).astype(jnp.float32),
                      axis=-1, keepdims=True)                        # (tm, 1) f32
        if labels_normalized:
            per_row = lse - dot
        else:
            sl_sum = jnp.sum(sl.astype(jnp.float32), axis=-1, keepdims=True)
            per_row = lse * sl_sum - dot
    else:
        xf = x.astype(jnp.float32)
        slf = sl.astype(jnp.float32)
        m = jnp.max(xf, axis=-1, keepdims=True)                      # (tm, 1)
        shifted = xf - m                                             # (tm, C)
        lse = jnp.log(jnp.sum(jnp.exp(shifted), axis=-1, keepdims=True))
        dot = jnp.sum(slf * shifted, axis=-1, keepdims=True)
        if labels_normalized:
            per_row = lse - dot
        else:
            sl_sum = jnp.sum(slf, axis=-1, keepdims=True)
            per_row = lse * sl_sum - dot

    if mask_rows:
        # Last tile may extend past B: mask the (tm, 1) per-row result (cheap)
        # rather than the full (tm, C) inputs.  Garbage/NaN rows are row-local
        # and replaced by 0 here, so they contribute nothing to the tile sum.
        row0 = pl.program_id(0) * tile_rows
        rid = jax.lax.broadcasted_iota(jnp.int32, (tile_rows, 1), 0) + row0
        per_row = jnp.where(rid < n_rows, per_row, 0.0)

    # One f32 partial sum per tile, broadcast into a dense (8, 128) block so the
    # writeback is a single unmasked vreg store per grid step (lane-dense output).
    partial = jnp.sum(per_row, keepdims=True)                        # (1, 1) f32
    out_ref[...] = jnp.broadcast_to(partial, (8, 128)).astype(jnp.float32)


def softlabel_cross_entropy_loss(logits, soft_labels, *, tile_rows=None,
                                 labels_normalized=False):
    """Pallas TPU implementation of SoftlabelCrossEntropyLoss.forward.

    logits, soft_labels: arrays of the same shape (..., C).  Softmax is taken
    over the last axis; the loss is the mean over all leading dims.  Returns a
    scalar f32 loss.  Set labels_normalized=True only if each soft-label row is
    guaranteed to sum to 1 (skips one reduction).
    """
    assert logits.shape == soft_labels.shape
    C = logits.shape[-1]
    B = 1
    for d in logits.shape[:-1]:
        B *= int(d)
    logits = logits.reshape(B, C)
    soft_labels = soft_labels.reshape(B, C)

    # The reference module only makes sense for floating inputs.
    if not jnp.issubdtype(logits.dtype, jnp.floating):
        logits = logits.astype(jnp.float32)
    if not jnp.issubdtype(soft_labels.dtype, jnp.floating):
        soft_labels = soft_labels.astype(jnp.float32)

    item_a = jnp.dtype(logits.dtype).itemsize
    item_b = jnp.dtype(soft_labels.dtype).itemsize
    sub = max(_sublane_multiple(item_a), _sublane_multiple(item_b))
    vmem_cap = _vmem_capacity_bytes()

    if tile_rows is None:
        tile_rows = _pick_tile_rows(B, C, item_a, item_b, vmem_cap)
    else:
        tile_rows = -(-int(tile_rows) // sub) * sub   # round up to sublane multiple

    num_tiles = -(-B // tile_rows)
    mask_rows = (B % tile_rows) != 0

    kernel = functools.partial(
        _softlabel_ce_kernel,
        tile_rows=tile_rows,
        n_rows=B,
        mask_rows=mask_rows,
        labels_normalized=labels_normalized,
    )

    cost = pl.CostEstimate(
        flops=6 * B * C,
        transcendentals=B * C + B,              # exp per element + log per row
        bytes_accessed=int(B * C * (item_a + item_b) + num_tiles * 8 * 128 * 4),
    )

    vmem_limit = (64 if vmem_cap >= 100 * _MIB else 40) * _MIB

    partials = pl.pallas_call(
        kernel,
        out_shape=jax.ShapeDtypeStruct((num_tiles * 8, 128), jnp.float32),
        grid_spec=pltpu.PrefetchScalarGridSpec(
            num_scalar_prefetch=0,
            grid=(num_tiles,),
            in_specs=[
                # Full-C blocks: legal for any C (block dim == array dim), so no
                # wrapper-side lane padding and no extra HBM pass over the inputs.
                # NOTE: only bump to pipeline_mode=pl.Buffered(3) if an xprof
                # trace shows exposed per-step DMA gaps.
                pl.BlockSpec((tile_rows, C), lambda i: (i, 0)),
                pl.BlockSpec((tile_rows, C), lambda i: (i, 0)),
            ],
            out_specs=pl.BlockSpec((8, 128), lambda i: (i, 0)),
        ),
        compiler_params=pltpu.CompilerParams(
            # Independent per-tile partial sums -> batch axis is parallel (lets
            # Mosaic shard tiles across both TensorCores on v7x).
            dimension_semantics=("parallel",),
            vmem_limit_bytes=vmem_limit,
        ),
        cost_estimate=cost,
    )(logits, soft_labels)

    # Tiny final reduction: one f32 scalar per tile (every element of each (8,128)
    # block holds that tile's partial sum); masked rows contributed exactly 0.
    return jnp.sum(partials[::8, 0]) / jnp.float32(B)


if __name__ == "__main__":
    key = jax.random.PRNGKey(0)
    k1, k2 = jax.random.split(key)

    def ref_loss(lg, sl):
        lg = lg.astype(jnp.float32)
        sl = sl.astype(jnp.float32)
        return jnp.mean(jnp.sum(-sl * jax.nn.log_softmax(lg, axis=-1), axis=-1))

    # 1) f32 inputs with a class dim that is NOT a lane multiple (exercises the
    #    unpadded full-C block path).
    B, C = 32, 100
    logits = jax.random.normal(k1, (B, C), dtype=jnp.float32)
    soft_labels = jax.nn.softmax(
        jax.random.normal(k2, (B, C), dtype=jnp.float32), axis=-1)

    loss = jax.jit(softlabel_cross_entropy_loss)(logits, soft_labels)
    loss = jax.block_until_ready(loss)
    ref = ref_loss(logits, soft_labels)
    assert jnp.allclose(loss, ref, rtol=1e-5, atol=1e-5), (loss, ref)

    # 2) Ragged batch with an explicit small tile (exercises the row-mask path
    #    and multiple grid steps).
    loss2 = jax.jit(
        functools.partial(softlabel_cross_entropy_loss, tile_rows=16)
    )(logits[:24], soft_labels[:24])
    loss2 = jax.block_until_ready(loss2)
    ref2 = ref_loss(logits[:24], soft_labels[:24])
    assert jnp.allclose(loss2, ref2, rtol=1e-5, atol=1e-5), (loss2, ref2)

    # 3) bf16 inputs (exercises the bf16-native compute path, the 16-row sublane
    #    rounding, and result masking).
    lg_bf = logits[:24].astype(jnp.bfloat16)
    sl_bf = soft_labels[:24].astype(jnp.bfloat16)
    loss3 = jax.jit(softlabel_cross_entropy_loss)(lg_bf, sl_bf)
    loss3 = jax.block_until_ready(loss3)
    ref3 = ref_loss(lg_bf, sl_bf)
    assert jnp.allclose(loss3, ref3, rtol=5e-2, atol=5e-2), (loss3, ref3)

    print("KERNEL_OK")
</pallas_src>

<mosaic_0001>
module attributes {stable_mosaic.version = 11 : i64} {
  func.func @_softlabel_ce_kernel(%arg0: i32, %arg1: memref<32x100xf32, #tpu.memory_space<vmem>>, %arg2: memref<32x100xf32, #tpu.memory_space<vmem>>, %arg3: memref<8x128xf32, #tpu.memory_space<vmem>>) attributes {dimension_semantics = [#tpu.dimension_semantics<parallel>], iteration_bounds = array<i64: 1>, scalar_prefetch = 0 : i64, scratch_operands = 0 : i64, tpu.core_type = #tpu.core_type<tc>, window_params = [{transform_indices = @transform_0, window_bounds = array<i64: 32, 100>}, {transform_indices = @transform_1, window_bounds = array<i64: 32, 100>}, {transform_indices = @transform_2, window_bounds = array<i64: 8, 128>}]} {
    %c0 = arith.constant 0 : index
    %c0_0 = arith.constant 0 : index
    %0 = vector.load %arg1[%c0, %c0_0] : memref<32x100xf32, #tpu.memory_space<vmem>>, vector<32x100xf32>
    %c0_1 = arith.constant 0 : index
    %c0_2 = arith.constant 0 : index
    %1 = vector.load %arg2[%c0_1, %c0_2] : memref<32x100xf32, #tpu.memory_space<vmem>>, vector<32x100xf32>
    %cst = arith.constant dense<0xFF800000> : vector<32xf32>
    %2 = vector.multi_reduction <maximumf>, %0, %cst [1] : vector<32x100xf32> to vector<32xf32>
    %3 = vector.shape_cast %2 : vector<32xf32> to vector<32x1xf32>
    %4 = vector.broadcast %3 : vector<32x1xf32> to vector<32x100xf32>
    %5 = arith.subf %0, %4 : vector<32x100xf32>
    %6 = math.exp %5 : vector<32x100xf32>
    %cst_3 = arith.constant dense<0.000000e+00> : vector<32xf32>
    %7 = vector.multi_reduction <add>, %6, %cst_3 [1] : vector<32x100xf32> to vector<32xf32>
    %8 = vector.shape_cast %7 : vector<32xf32> to vector<32x1xf32>
    %9 = math.log %8 : vector<32x1xf32>
    %10 = arith.mulf %1, %5 : vector<32x100xf32>
    %cst_4 = arith.constant dense<0.000000e+00> : vector<32xf32>
    %11 = vector.multi_reduction <add>, %10, %cst_4 [1] : vector<32x100xf32> to vector<32xf32>
    %12 = vector.shape_cast %11 : vector<32xf32> to vector<32x1xf32>
    %cst_5 = arith.constant dense<0.000000e+00> : vector<32xf32>
    %13 = vector.multi_reduction <add>, %1, %cst_5 [1] : vector<32x100xf32> to vector<32xf32>
    %14 = vector.shape_cast %13 : vector<32xf32> to vector<32x1xf32>
    %15 = arith.mulf %9, %14 : vector<32x1xf32>
    %16 = arith.subf %15, %12 : vector<32x1xf32>
    %17 = vector.shape_cast %16 : vector<32x1xf32> to vector<1x32x1xf32>
    %cst_6 = arith.constant dense<0.000000e+00> : vector<1xf32>
    %18 = vector.multi_reduction <add>, %17, %cst_6 [1, 2] : vector<1x32x1xf32> to vector<1xf32>
    %19 = vector.shape_cast %18 : vector<1xf32> to vector<1x1x1xf32>
    %20 = vector.extract %19[0, 0, 0] : f32 from vector<1x1x1xf32>
    %21 = vector.broadcast %20 : f32 to vector<1x1xf32>
    %22 = vector.shape_cast %21 : vector<1x1xf32> to vector<1x1xf32>
    %23 = vector.broadcast %22 : vector<1x1xf32> to vector<8x128xf32>
    %c0_7 = arith.constant 0 : index
    %c0_8 = arith.constant 0 : index
    %24 = vector.load %arg3[%c0_7, %c0_8] : memref<8x128xf32, #tpu.memory_space<vmem>>, vector<8x128xf32>
    tpu.vector_store %arg3[%c0_7, %c0_8], %23 {strides = array<i32>} : memref<8x128xf32, #tpu.memory_space<vmem>>, vector<8x128xf32>,
    return
  }
  func.func @transform_0(%arg0: i32) -> (i32, i32) {
    %c0_i32 = arith.constant 0 : i32
    %c0_i32_0 = arith.constant 0 : i32
    return %arg0, %c0_i32 : i32, i32
  }
  func.func @transform_1(%arg0: i32) -> (i32, i32) {
    %c0_i32 = arith.constant 0 : i32
    %c0_i32_0 = arith.constant 0 : i32
    return %arg0, %c0_i32 : i32, i32
  }
  func.func @transform_2(%arg0: i32) -> (i32, i32) {
    %c0_i32 = arith.constant 0 : i32
    %c0_i32_0 = arith.constant 0 : i32
    return %arg0, %c0_i32 : i32, i32
  }
}

</mosaic_0001>

<bundles_post_ra>
// kernel: softlabel_cross_entropy_loss.1
= control target key start
LH: loop header
LB: loop body
LE: loop exit
PB: predicated region body
PF: predicated region fallthrough
CT: control target
= control target key end

     0   :  { %7 = vsyncpa [#allocation3], 0  ;;  %s263_s0 = inlined_call_operand.hbm [shape: f32[32,100], index: 0, kind: input, shape index: {}]   ;;  %s264_s1 = inlined_call_operand.hbm [shape: f32[32,100], index: 1, kind: input, shape index: {}]   ;;  %s265_s2 = inlined_call_operand.vmem [shape: f32[8,128], index: 2, kind: output, shape index: {}]  }
   0x1   :  { %8 = vsyncpa [#allocation5], 0  ;;  %s219_s9 = smov [#allocation2]  }
   0x2   :  { %s14_s10 = sshll.u32 %s219_s9, 4  ;;  %s15_s10 = int_to_ptr.vmem [resolvable:$true] %s14_s10 }
   0x3   :  { %s183_s11 = scalar_lea.vmem %s15_s10, 512  ;;  %p188_p1 = scmp.lt.s32.totalorder %s15_s10, %s15_s10 }
   0x4   :  { %p184_p0 = scmp.ne.s32.totalorder %s15_s10, %s183_s11  ;;  %p189_p2 = scmp.lt.s32.totalorder %s183_s11, %s183_s11 }
   0x6   :  { %p190_p3 = por %p189_p2, %p188_p1 }
   0x8   :  { %p191_p4 = pnand %p190_p3, %p184_p0 }
   0xa   :  { %194 = shalt.err (!%p191_p4)
}
   0xb   :  { %s220_s12 = smov 128   ;;  %s221_s13 = smov 8  }
   0xc   :  { %20 = dma.hbm_to_vmem [thread:$0]  %s263_s0, 512, %s15_s10, [#allocation3], %s220_s12, %s220_s12, %s221_s13  }
   0xd   :  { %s222_s16 = smov [#allocation4]  }
   0xe   :  { %s26_s17 = sshll.u32 %s222_s16, 4  ;;  %s27_s17 = int_to_ptr.vmem [resolvable:$true] %s26_s17 }
   0xf   :  { %s203_s18 = scalar_lea.vmem %s27_s17, 512  ;;  %p208_p6 = scmp.lt.s32.totalorder %s27_s17, %s27_s17 }
  0x10   :  { %p204_p5 = scmp.ne.s32.totalorder %s27_s17, %s203_s18  ;;  %p209_p7 = scmp.lt.s32.totalorder %s203_s18, %s203_s18 }
  0x12   :  { %p210_p8 = por %p209_p7, %p208_p6 }
  0x14   :  { %p211_p9 = pnand %p210_p8, %p204_p5 }
  0x16   :  { %214 = shalt.err (!%p211_p9)
}
  0x17   :  { %32 = dma.hbm_to_vmem [thread:$0]  %s264_s1, 512, %s27_s17, [#allocation5], %s220_s12, %s220_s12, %s221_s13  }
  0x18   :  { %215 = dma.done.wait [#allocation3], 512  }
  0x19   :  { %216 = vsyncadd [#allocation3], 4294966784 }
  0x1a   :  { %217 = dma.done.wait [#allocation5], 512  }
  0x1b   :  { %218 = vsyncadd [#allocation5], 4294966784  ;;  %vm47_vm0 = vcmask 818176   ;;  %v39_v0 = vld [vmem:[#allocation2] sm:$0xff]  ;;  %v41_v1 = vld [vmem:[#allocation2 + $0x10] sm:$0xff]  ;;  %vm128_vm1 = vcmask 7168  }
  0x1c   :  { %v40_v2 = vld [vmem:[#allocation2 + $0x8] sm:$0xff]  ;;  %v48_v3 = vsel %vm47_vm0, %v39_v0, -inf  ;;  %v54_v4 = vsel %vm47_vm0, %v41_v1, -inf  ;;  %v42_v5 = vld [vmem:[#allocation2 + $0x18] sm:$0xff]  ;;  %v43_v27 = vld [vmem:[#allocation4] sm:$0xff] }
  0x1d   :  { %49 = vmax.xlane.f32.xlu0 %v48_v3  ;;  %55 = vmax.xlane.f32.xlu1 %v54_v4  ;;  %v51_v6 = vsel %vm47_vm0, %v40_v2, -inf  ;;  %v57_v7 = vsel %vm47_vm0, %v42_v5, -inf  ;;  %v108_v28 = vsel %vm47_vm0, %v43_v27, 0.0  ;;  %v44_v31 = vld [vmem:[#allocation4 + $0x8] sm:$0xff]  ;;  %v45_v35 = vld [vmem:[#allocation4 + $0x10] sm:$0xff]  ;;  %v46_v39 = vld [vmem:[#allocation4 + $0x18] sm:$0xff] }
  0x1e   :  { %v111_v32 = vsel %vm47_vm0, %v44_v31, 0.0  ;;  %v114_v36 = vsel %vm47_vm0, %v45_v35, 0.0  ;;  %v117_v40 = vsel %vm47_vm0, %v46_v39, 0.0 }
  0x21   :  { %52 = vmax.xlane.f32.xlu0 %v51_v6  ;;  %58 = vmax.xlane.f32.xlu1 %v57_v7 }
  0xa6   :  { %v50_v8 = vpop.xlane.xlu0 %49  ;;  %v56_v9 = vpop.xlane.xlu1 %55 }
  0xa7   :  { %v60_v10 = vsub.f32 %v39_v0, %v50_v8  ;;  %v62_v11 = vsub.f32 %v41_v1, %v56_v9 }
  0xa9   :  { %v64_v12 = vmul.f32 1.442695, %v60_v10  ;;  %v68_v13 = vmul.f32 1.442695, %v62_v11  ;;  %v92_v30 = vmul.f32 %v60_v10, %v43_v27  ;;  %v94_v38 = vmul.f32 %v62_v11, %v45_v35 }
  0xaa   :  { %v53_v14 = vpop.xlane.xlu0 %52  ;;  %v59_v15 = vpop.xlane.xlu1 %58 }
  0xab   :  { %159 = vpow2.f32 %v64_v12  ;;  %v61_v16 = vsub.f32 %v40_v2, %v53_v14  ;;  %v63_v17 = vsub.f32 %v42_v5, %v59_v15  ;;  %v96_v33 = vsel %vm47_vm0, %v92_v30, 0.0 }
  0xac   :  { %161 = vpow2.f32 %v68_v13  ;;  %v102_v41 = vsel %vm47_vm0, %v94_v38, 0.0 }
  0xad   :  { %v66_v18 = vmul.f32 1.442695, %v61_v16  ;;  %v70_v19 = vmul.f32 1.442695, %v63_v17  ;;  %v93_v34 = vmul.f32 %v61_v16, %v44_v31  ;;  %v95_v42 = vmul.f32 %v63_v17, %v46_v39 }
  0xaf   :  { %163 = vpow2.f32 %v66_v18  ;;  %v99_v37 = vsel %vm47_vm0, %v93_v34, 0.0  ;;  %v105_v43 = vsel %vm47_vm0, %v95_v42, 0.0 }
  0xb0   :  { %165 = vpow2.f32 %v70_v19 }
  0xb8   :  { %v160_v20 = vpop.eup %159 }
  0xb9   :  { %v162_v21 = vpop.eup %161  ;;  %v72_v22 = vsel %vm47_vm0, %v160_v20, 0.0 }
  0xba   :  { %73 = vadd.xlane.f32.xlu0 %v72_v22  ;;  %v78_v23 = vsel %vm47_vm0, %v162_v21, 0.0 }
  0xbc   :  { %v164_v24 = vpop.eup %163 }
  0xbd   :  { %v166_v25 = vpop.eup %165  ;;  %v75_v26 = vsel %vm47_vm0, %v164_v24, 0.0 }
  0xbe   :  { %79 = vadd.xlane.f32.xlu0 %v78_v23  ;;  %76 = vadd.xlane.f32.xlu1 %v75_v26  ;;  %v81_v29 = vsel %vm47_vm0, %v166_v25, 0.0 }
  0xc2   :  { %109 = vadd.xlane.f32.xlu0 %v108_v28  ;;  %82 = vadd.xlane.f32.xlu1 %v81_v29 }
  0xc6   :  { %97 = vadd.xlane.f32.xlu0 %v96_v33  ;;  %112 = vadd.xlane.f32.xlu1 %v111_v32 }
  0xca   :  { %100 = vadd.xlane.f32.xlu1 %v99_v37  ;;  %115 = vadd.xlane.f32.xlu0 %v114_v36 }
  0xce   :  { %103 = vadd.xlane.f32.xlu1 %v102_v41  ;;  %118 = vadd.xlane.f32.xlu0 %v117_v40 }
  0xd2   :  { %106 = vadd.xlane.f32.xlu1 %v105_v43 }
 0x143   :  { %v74_v44 = vpop.xlane.xlu0 %73 }
 0x144   :  { %167 = vlog2.f32 %v74_v44 }
 0x147   :  { %v77_v45 = vpop.xlane.xlu1 %76  ;;  %v80_v46 = vpop.xlane.xlu0 %79 }
 0x148   :  { %169 = vlog2.f32 %v77_v45 }
 0x149   :  { %171 = vlog2.f32 %v80_v46 }
 0x14b   :  { %v83_v47 = vpop.xlane.xlu1 %82  ;;  %v110_v48 = vpop.xlane.xlu0 %109 }
 0x14c   :  { %173 = vlog2.f32 %v83_v47 }
 0x14f   :  { %v113_v49 = vpop.xlane.xlu1 %112  ;;  %v98_v50 = vpop.xlane.xlu0 %97 }
 0x151   :  { %v168_v51 = vpop.eup %167 }
 0x152   :  { %v85_v52 = vmul.f32 0.6931472, %v168_v51 }
 0x153   :  { %v101_v53 = vpop.xlane.xlu1 %100  ;;  %v116_v54 = vpop.xlane.xlu0 %115 }
 0x154   :  { %v120_v55 = vmul.f32 %v110_v48, %v85_v52 }
 0x155   :  { %v170_v56 = vpop.eup %169 }
 0x156   :  { %v172_v57 = vpop.eup %171  ;;  %v87_v58 = vmul.f32 0.6931472, %v170_v56  ;;  %v124_v62 = vsub.f32 %v120_v55, %v98_v50 }
 0x157   :  { %v104_v59 = vpop.xlane.xlu1 %103  ;;  %v89_v60 = vmul.f32 0.6931472, %v172_v57  ;;  %v119_v1 = vpop.xlane.xlu0 %118 }
 0x158   :  { %v121_v61 = vmul.f32 %v113_v49, %v87_v58  ;;  %v129_v5 = vsel %vm128_vm1, %v124_v62, 0.0 }
 0x159   :  { %v174_v63 = vpop.eup %173  ;;  %v122_v0 = vmul.f32 %v116_v54, %v89_v60 }
 0x15a   :  { %v125_v2 = vsub.f32 %v121_v61, %v101_v53  ;;  %v91_v3 = vmul.f32 0.6931472, %v174_v63 }
 0x15b   :  { %v126_v4 = vsub.f32 %v122_v0, %v104_v59  ;;  %v107_v9 = vpop.xlane.xlu1 %106 }
 0x15c   :  { %v130_v6 = vsel %vm128_vm1, %v125_v2, 0.0  ;;  %v123_v7 = vmul.f32 %v119_v1, %v91_v3 }
 0x15d   :  { %v131_v8 = vadd.f32 %v130_v6, %v129_v5  ;;  %v132_v11 = vsel %vm128_vm1, %v126_v4, 0.0 }
 0x15e   :  { %v127_v10 = vsub.f32 %v123_v7, %v107_v9 }
 0x15f   :  { %v133_v12 = vadd.f32 %v132_v11, %v131_v8 }
 0x160   :  { %v134_v13 = vsel %vm128_vm1, %v127_v10, 0.0 }
 0x161   :  { %v135_v14 = vadd.f32 %v134_v13, %v133_v12 }
 0x163   :  { %136 = vadd.xlane.f32.xlu0 %v135_v14 }
 0x1ec   :  { %v137_v15 = vpop.xlane.xlu0 %136 }
 0x1ed   :  { %v138_v16 = vrot.slane %v137_v15, 4 }
 0x1ef   :  { %v139_v17 = vadd.f32 %v138_v16, %v137_v15 }
 0x1f1   :  { %v140_v18 = vrot.slane %v139_v17, 2 }
 0x1f3   :  { %v141_v19 = vadd.f32 %v140_v18, %v139_v17 }
 0x1f5   :  { %v142_v20 = vrot.slane %v141_v19, 1 }
 0x1f7   :  { %v143_v21 = vadd.f32 %v142_v20, %v141_v19 }
 0x1f9   :  { %153 = vpush %v143_v21 }
 0x22a   :  { %s154_s0 = spop %153 }
 0x22b   :  { %v145_v22 = vstv %s154_s0 }
 0x22c   :  { %146 = vst [vmem:[%s265_s2] sm:$0xff] %v145_v22 }
 0x22d   :  { %151 = vsyncpa [#allocation3], 1 }
 0x22e   :  { %152 = vsyncpa [#allocation5], 1 }

</bundles_post_ra>
